<compile_context>
chip_gen: v7x
topology: tpu7x:2x2x1
jax: 0.10.0
libtpu: 0.0.40
codegen_flags: <defaults>
</compile_context>

<pallas_src>
import math
import jax
import jax.numpy as jnp
from jax.experimental import pallas as pl
from jax.experimental.pallas import tpu as pltpu


def _linear_kernel(x_ref, p_ref, o_ref):
    # x_ref: (B, 2) f32 in VMEM.
    # p_ref: (6,) f32 in SMEM laid out as
    #   [w_t[0,0], w_t[0,1], w_t[1,0], w_t[1,1], b[0], b[1]]
    # where w_t = W.T (shape (in, out)), so out = x @ w_t + b.
    x0 = x_ref[:, 0:1]                                   # (B, 1)
    x1 = x_ref[:, 1:2]                                   # (B, 1)
    # Unrolled VPU scalar-broadcast FMAs; two direct column stores (no concat).
    o_ref[:, 0:1] = (x0 * p_ref[0] + x1 * p_ref[2] + p_ref[4]).astype(o_ref.dtype)
    o_ref[:, 1:2] = (x0 * p_ref[1] + x1 * p_ref[3] + p_ref[5]).astype(o_ref.dtype)


def pack_sexnet_params(w, b):
    """Pack Linear(2, 2) params once into a (6,) f32 SMEM-friendly vector.

    w: (2, 2) f32 in PyTorch layout (out_features, in_features)
    b: (2,)  f32
    Layout: W.T (in, out) flattened row-major, then bias.
    """
    assert w.shape == (2, 2) and b.shape == (2,), "packed for Linear(2, 2) only"
    return jnp.concatenate([w.T.reshape(-1), b.reshape(-1)]).astype(jnp.float32)


def sexnet_forward(x, params):
    """Forward pass of SexNet: out = x @ W.T + b.

    x:      (B, 2) f32
    params: (6,)   f32 from pack_sexnet_params (packed once, reused every call)
    """
    B, Fin = x.shape
    assert Fin == 2 and params.shape == (6,), "kernel is unrolled for Linear(2, 2)"
    Fout = 2

    return pl.pallas_call(
        _linear_kernel,
        out_shape=jax.ShapeDtypeStruct((B, Fout), x.dtype),
        in_specs=[
            pl.BlockSpec(memory_space=pltpu.MemorySpace.VMEM),   # x
            pl.BlockSpec(memory_space=pltpu.MemorySpace.SMEM),   # packed params
        ],
        out_specs=pl.BlockSpec(memory_space=pltpu.MemorySpace.VMEM),
    )(x, params)


if __name__ == "__main__":
    key = jax.random.PRNGKey(0)
    k_x, k_w, k_b = jax.random.split(key, 3)

    batch, in_features, out_features = 8, 2, 2

    # Deterministic parameter init mimicking torch.nn.Linear default
    # (uniform in [-1/sqrt(fan_in), 1/sqrt(fan_in)]).
    bound = 1.0 / math.sqrt(in_features)
    w = jax.random.uniform(k_w, (out_features, in_features),
                           minval=-bound, maxval=bound, dtype=jnp.float32)
    b = jax.random.uniform(k_b, (out_features,),
                           minval=-bound, maxval=bound, dtype=jnp.float32)

    x = jax.random.normal(k_x, (batch, in_features), dtype=jnp.float32)

    # Pack params ONCE (outside the per-call path), then run the kernel.
    params = pack_sexnet_params(w, b)
    out = sexnet_forward(x, params)
    out = jax.block_until_ready(out)

    # Reference check against plain-JAX linear (same semantics as torch Linear).
    ref = x @ w.T + b
    assert out.shape == (batch, out_features)
    assert jnp.allclose(out, ref, atol=1e-5, rtol=1e-5)

    print("KERNEL_OK")
</pallas_src>

<mosaic_0001>
module attributes {stable_mosaic.version = 11 : i64} {
  func.func @_linear_kernel(%arg0: memref<8x2xf32, #tpu.memory_space<vmem>>, %arg1: memref<6xf32, #tpu.memory_space<smem>>, %arg2: memref<8x2xf32, #tpu.memory_space<vmem>>) attributes {dimension_semantics = [], scalar_prefetch = 0 : i64, scratch_operands = 0 : i64, tpu.core_type = #tpu.core_type<tc>} {
    %c0 = arith.constant 0 : index
    %c0_0 = arith.constant 0 : index
    %0 = vector.load %arg0[%c0, %c0_0] : memref<8x2xf32, #tpu.memory_space<vmem>>, vector<8x1xf32>
    %c0_1 = arith.constant 0 : index
    %c1 = arith.constant 1 : index
    %1 = vector.load %arg0[%c0_1, %c1] : memref<8x2xf32, #tpu.memory_space<vmem>>, vector<8x1xf32>
    %c0_2 = arith.constant 0 : index
    %2 = memref.load %arg1[%c0_2] : memref<6xf32, #tpu.memory_space<smem>>
    %3 = vector.broadcast %2 : f32 to vector<8x1xf32>
    %4 = arith.mulf %0, %3 : vector<8x1xf32>
    %c2 = arith.constant 2 : index
    %5 = memref.load %arg1[%c2] : memref<6xf32, #tpu.memory_space<smem>>
    %6 = vector.broadcast %5 : f32 to vector<8x1xf32>
    %7 = arith.mulf %1, %6 : vector<8x1xf32>
    %8 = arith.addf %4, %7 : vector<8x1xf32>
    %c4 = arith.constant 4 : index
    %9 = memref.load %arg1[%c4] : memref<6xf32, #tpu.memory_space<smem>>
    %10 = vector.broadcast %9 : f32 to vector<8x1xf32>
    %11 = arith.addf %8, %10 : vector<8x1xf32>
    %c0_3 = arith.constant 0 : index
    %c0_4 = arith.constant 0 : index
    %12 = vector.load %arg2[%c0_3, %c0_4] : memref<8x2xf32, #tpu.memory_space<vmem>>, vector<8x1xf32>
    tpu.vector_store %arg2[%c0_3, %c0_4], %11 {strides = array<i32>} : memref<8x2xf32, #tpu.memory_space<vmem>>, vector<8x1xf32>,
    %c1_5 = arith.constant 1 : index
    %13 = memref.load %arg1[%c1_5] : memref<6xf32, #tpu.memory_space<smem>>
    %14 = vector.broadcast %13 : f32 to vector<8x1xf32>
    %15 = arith.mulf %0, %14 : vector<8x1xf32>
    %c3 = arith.constant 3 : index
    %16 = memref.load %arg1[%c3] : memref<6xf32, #tpu.memory_space<smem>>
    %17 = vector.broadcast %16 : f32 to vector<8x1xf32>
    %18 = arith.mulf %1, %17 : vector<8x1xf32>
    %19 = arith.addf %15, %18 : vector<8x1xf32>
    %c5 = arith.constant 5 : index
    %20 = memref.load %arg1[%c5] : memref<6xf32, #tpu.memory_space<smem>>
    %21 = vector.broadcast %20 : f32 to vector<8x1xf32>
    %22 = arith.addf %19, %21 : vector<8x1xf32>
    %c0_6 = arith.constant 0 : index
    %c1_7 = arith.constant 1 : index
    %23 = vector.load %arg2[%c0_6, %c1_7] : memref<8x2xf32, #tpu.memory_space<vmem>>, vector<8x1xf32>
    tpu.vector_store %arg2[%c0_6, %c1_7], %22 {strides = array<i32>} : memref<8x2xf32, #tpu.memory_space<vmem>>, vector<8x1xf32>,
    return
  }
}

</mosaic_0001>

<bundles_post_ra>
// kernel: tpu_custom_call.1
= control target key start
LH: loop header
LB: loop body
LE: loop exit
PB: predicated region body
PF: predicated region fallthrough
CT: control target
= control target key end

     0   :  { %7 = vsyncpa [#allocation3], 0  ;;  %s118_s0 = inlined_call_operand.vmem [shape: f32[8,2], index: 0, kind: input, shape index: {}]   ;;  %s119_s1 = inlined_call_operand.vmem [shape: f32[6], index: 1, kind: input, shape index: {}]   ;;  %s120_s2 = inlined_call_operand.vmem [shape: f32[8,2], index: 2, kind: output, shape index: {}]  }
   0x1   :  { %s16_s11 = sshll.u32 %s119_s1, 4  ;;  %s17_s11 = int_to_ptr.vmem [resolvable:$true] %s16_s11 }
   0x2   :  { %s74_s12 = scalar_lea.vmem %s17_s11, 16  ;;  %p79_p1 = scmp.lt.s32.totalorder %s17_s11, %s17_s11 }
   0x3   :  { %p75_p0 = scmp.ne.s32.totalorder %s17_s11, %s74_s12  ;;  %p80_p2 = scmp.lt.s32.totalorder %s74_s12, %s74_s12 }
   0x5   :  { %p81_p3 = por %p80_p2, %p79_p1 }
   0x7   :  { %p82_p4 = pnand %p81_p3, %p75_p0 }
   0x9   :  { %85 = shalt.err (!%p82_p4)
}
   0xa   :  { %s88_s13 = smov [#allocation2]  }
   0xb   :  { %19 = dma.vmem_to_smem %s17_s11, 16, %s88_s13, [#allocation3]  }
   0xc   :  { %86 = dma.done.wait [#allocation3], 16  }
   0xd   :  { %87 = vsyncadd [#allocation3], 4294967280 }
   0xe   :  { %23 = sfence }
   0xf   :  { %s69_s14 = sld [smem:[#allocation2 + $0x3]]  ;;  %s66_s15 = sld [smem:[#allocation2 + $0x2]]  ;;  %v24_v0 = vld [vmem:[%s118_s0] sm:$0xff]  ;;  %vm39_vm0 = vcmask 7168   ;;  %vm59_vm1 = vcmask 15368  }
  0x10   :  { %s89_s1 = smov 127   ;;  %s68_s18 = sld [smem:[#allocation2 + $0x1]] }
  0x11   :  { %s25_s19 = sld [smem:[#allocation2]]  ;;  %s70_s20 = sld [smem:[#allocation2 + $0x5]] }
  0x12   :  { %s67_s21 = sld [smem:[#allocation2 + $0x4]]  ;;  %s90_s0 = smov 1  }
  0x15   :  { %v45_v1 = vstv %s69_s14  ;;  %v29_v3 = vstv %s66_s15 }
  0x16   :  { %v46_v2 = vmul.f32 %v45_v1, %v24_v0  ;;  %v30_v4 = vmul.f32 %v29_v3, %v24_v0  ;;  %v42_v5 = vstv %s68_s18 }
  0x17   :  { %v43_v6 = vmul.f32 %v42_v5, %v24_v0  ;;  %v26_v7 = vstv %s25_s19  ;;  %v53_v9 = vstv %s70_s20 }
  0x18   :  { %48 = vrot.lane.b32.xlu0 %v46_v2, %s89_s1  ;;  %v27_v11 = vmul.f32 %v26_v7, %v24_v0  ;;  %v37_v13 = vstv %s67_s21 }
  0x1c   :  { %32 = vrot.lane.b32.xlu0 %v30_v4, %s89_s1 }
  0x8a   :  { %v49_v8 = vpop.permute.xlu0 %48 }
  0x8b   :  { %v51_v10 = vadd.f32 %v49_v8, %v43_v6 }
  0x8d   :  { %v54_v12 = vadd.f32 %v53_v9, %v51_v10 }
  0x8e   :  { %v33_v14 = vpop.permute.xlu0 %32 }
  0x8f   :  { %56 = vrot.lane.b32.xlu1 %v54_v12, %s90_s0  ;;  %v35_v15 = vadd.f32 %v33_v14, %v27_v11 }
  0x91   :  { %v38_v16 = vadd.f32 %v37_v13, %v35_v15 }
  0x93   :  { %40 = vst.msk [vmem:[%s120_s2] sm:$0xff] %vm39_vm0, %v38_v16 }
 0x101   :  { %v57_v17 = vpop.permute.xlu1 %56 }
 0x102   :  { %60 = vst.msk [vmem:[%s120_s2] sm:$0xff] %vm59_vm1, %v57_v17 }
 0x103   :  { %65 = vsyncpa [#allocation3], 1 }

</bundles_post_ra>
